<compile_context>
chip_gen: v5e
topology: v5e:2x2
jax: 0.10.0
libtpu: 0.0.40
codegen_flags: <defaults>
</compile_context>

<pallas_src>
import functools

import jax
import jax.numpy as jnp
from jax.experimental import pallas as pl
from jax.experimental.pallas import tpu as pltpu


# ---------------------------------------------------------------------------
# Fused kernel: seg 1x1-conv (half-scaled) + tanh + per-tile partial stats
# ---------------------------------------------------------------------------
def _fused_stats_kernel(hwb_ref, x0_ref, x1_ref, x2_ref, stats_ref, *,
                        hw_valid, thw, need_mask):
    x0 = x0_ref[...]                       # [nb, thw] dense per-channel blocks
    x1 = x1_ref[...]
    x2 = x2_ref[...]

    # Half-scaled seg logits: s_half = 0.5*(w·x + b); sigmoid(s) = 0.5*tanh(s_half)+0.5
    s_half = hwb_ref[0] * x0 + hwb_ref[1] * x1 + hwb_ref[2] * x2 + hwb_ref[3]
    th = jnp.tanh(s_half)                  # single EUP op per element

    if need_mask:
        # Only traced when spatial padding exists: padded x is 0 (sums fine),
        # but tanh / min / max must ignore padded pixels.
        lane = jax.lax.broadcasted_iota(jnp.int32, s_half.shape, 1)
        pos = pl.program_id(1) * thw + lane
        valid = pos < hw_valid
        th = jnp.where(valid, th, 0.0)
        s_mn = jnp.where(valid, s_half, jnp.inf)
        s_mx = jnp.where(valid, s_half, -jnp.inf)
    else:
        s_mn = s_half
        s_mx = s_half

    # Per-batch-row partial stats for this (batch-block, spatial-tile):
    # [Sx0, Sx1, Sx2, S_tanh, min(s_half), max(s_half)]  -> [nb, 6]
    stats_ref[0, 0] = jnp.concatenate(
        [jnp.sum(x0, axis=1, keepdims=True),
         jnp.sum(x1, axis=1, keepdims=True),
         jnp.sum(x2, axis=1, keepdims=True),
         jnp.sum(th, axis=1, keepdims=True),
         jnp.min(s_mn, axis=1, keepdims=True),
         jnp.max(s_mx, axis=1, keepdims=True)], axis=1)


# ---------------------------------------------------------------------------
# Tiling helpers
# ---------------------------------------------------------------------------
def _choose_spatial_tile(hw, target=256 * 128):
    """Returns (thw, num_tiles) with thw a multiple of 128, thw <= target,
    thw * num_tiles >= hw, and minimal padding."""
    hw128 = ((hw + 127) // 128) * 128
    if hw128 <= target:
        return hw128, 1
    ntiles = -(-hw // target)                       # cdiv
    thw = ((-(-hw // ntiles) + 127) // 128) * 128   # round_up(cdiv, 128)
    return thw, ntiles


def _choose_batch_tile(n):
    """Returns (n_padded, nb).  Never creates an oversized batch block."""
    if n % 8 == 0:
        return n, 8
    if n < 8:
        return n, n          # block == full dim -> layout-legal, no pad waste
    return ((n + 7) // 8) * 8, 8


# ---------------------------------------------------------------------------
# Wrapper
# ---------------------------------------------------------------------------
def wh_net_forward(x, params):
    """x: [N, 3, H, W] float32 (NCHW, matching the PyTorch module)."""
    N, C, H, W = x.shape
    assert C == 3, "con_c expects cat(x[3ch], mask[1ch]) = 4 channels"
    HW = H * W
    x3 = x.reshape(N, C, HW).astype(jnp.float32)     # free, contiguous reshape

    Npad, nb = _choose_batch_tile(N)
    thw, tB = _choose_spatial_tile(HW)
    HWpad = thw * tB
    need_mask = HWpad != HW

    if Npad != N or HWpad != HW:
        x3 = jnp.pad(x3, ((0, Npad - N), (0, 0), (0, HWpad - HW)))
    # Merge channel+spatial: contiguous, free.  A (nb, thw) block at
    # (batch-block n, channel c, spatial-tile t) has block index (n, c*tB + t).
    x2d = x3.reshape(Npad, 3 * HWpad)
    nB = Npad // nb

    seg_w = params['seg_w'].reshape(3).astype(jnp.float32)
    seg_b = params['seg_b'].reshape(1).astype(jnp.float32)
    hwb = 0.5 * jnp.concatenate([seg_w, seg_b])      # [4] half-scaled, in SMEM

    kern = functools.partial(_fused_stats_kernel,
                             hw_valid=HW, thw=thw, need_mask=need_mask)

    smem_spec = pl.BlockSpec(memory_space=pltpu.MemorySpace.SMEM)
    x_specs = [pl.BlockSpec((nb, thw), (lambda n, t, c=c: (n, c * tB + t)))
               for c in range(3)]

    stats = pl.pallas_call(
        kern,
        grid=(nB, tB),
        in_specs=[smem_spec] + x_specs,
        out_specs=pl.BlockSpec((1, 1, nb, 6), lambda n, t: (n, t, 0, 0)),
        out_shape=jax.ShapeDtypeStruct((nB, tB, nb, 6), jnp.float32),
        compiler_params=pltpu.CompilerParams(
            dimension_semantics=("parallel", "parallel")),
    )(hwb, x2d, x2d, x2d)

    # --- combine tiny partials (plain JAX) --------------------------------
    stats = stats.transpose(0, 2, 1, 3).reshape(Npad, tB, 6)[:N]   # drop pad rows
    sum_x = stats[..., 0:3].sum(axis=1)          # [N, 3]  per-batch channel sums
    s_tanh = stats[..., 3].sum(axis=1)           # [N]     sum tanh(s/2)
    mn_half = stats[..., 4].min()                # global min of s/2
    mx_half = stats[..., 5].max()                # global max of s/2

    # sigmoid is monotone: min/max(sigmoid(s)) == sigmoid(min/max(s))
    sig_min = 0.5 * jnp.tanh(mn_half) + 0.5
    sig_max = 0.5 * jnp.tanh(mx_half) + 0.5
    inv = 1.0 / (sig_max - sig_min + 1e-8)
    s_sig = 0.5 * s_tanh + 0.5 * jnp.float32(HW)            # sum sigmoid(s)
    s_res = (s_sig - sig_min * jnp.float32(HW)) * inv        # sum normalized mask

    # con_c (1x1 conv 4->3) + global average pool, by linearity of the pool.
    conv_w = params['conv_w'].astype(jnp.float32)             # [3, 4]
    conv_b = params['conv_b'].reshape(3).astype(jnp.float32)  # [3]
    sum4 = jnp.concatenate([sum_x, s_res[:, None]], axis=1)   # [N, 4]
    pooled = sum4 @ conv_w.T / jnp.float32(HW) + conv_b       # [N, 3]

    # cls_net stand-in tail: tiny [N,3] @ [3,K] matmul -- plain JAX.
    return pooled @ params['cls_w'] + params['cls_b']


# ---------------------------------------------------------------------------
# Pure-JAX reference (same semantics) for a correctness check
# ---------------------------------------------------------------------------
def wh_net_reference(x, params):
    s = (jnp.einsum('c,nchw->nhw', params['seg_w'].reshape(3), x)
         + params['seg_b'][0])
    res = jax.nn.sigmoid(s)
    res = (res - jnp.min(res)) / (jnp.max(res) - jnp.min(res) + 1e-8)
    im = jnp.concatenate([x, res[:, None, :, :]], axis=1)          # [N,4,H,W]
    conv = (jnp.einsum('ok,nkhw->nohw', params['conv_w'], im)
            + params['conv_b'].reshape(1, 3, 1, 1))
    pooled = conv.mean(axis=(2, 3))
    return pooled @ params['cls_w'] + params['cls_b']


# ---------------------------------------------------------------------------
# Deterministic parameter init + demo
# ---------------------------------------------------------------------------
def init_params(key, num_classes=2):
    k1, k2, k3, k4, k5 = jax.random.split(key, 5)
    return {
        # seg_net stand-in: 1x1 conv 3 -> 1 (produces lateral_map_2 logits)
        'seg_w': 0.1 * jax.random.normal(k1, (1, 3), jnp.float32),
        'seg_b': jnp.zeros((1,), jnp.float32),
        # con_c: Conv2d(in=4, out=3, kernel_size=1) -> weight [3,4], bias [3]
        'conv_w': 0.1 * jax.random.normal(k2, (3, 4), jnp.float32),
        'conv_b': 0.01 * jax.random.normal(k3, (3,), jnp.float32),
        # cls_net stand-in: global avg pool + linear 3 -> num_classes
        'cls_w': 0.1 * jax.random.normal(k4, (3, num_classes), jnp.float32),
        'cls_b': 0.01 * jax.random.normal(k5, (num_classes,), jnp.float32),
    }


if __name__ == "__main__":
    key = jax.random.PRNGKey(0)
    k_param, k_x = jax.random.split(key)
    params = init_params(k_param, num_classes=2)

    # NCHW input: 3 channels (con_c consumes cat(x, 1-ch mask) = 4 channels)
    x = jax.random.normal(k_x, (2, 3, 16, 16), jnp.float32)

    out = jax.jit(wh_net_forward)(x, params)
    jax.block_until_ready(out)
    assert out.shape == (2, 2)

    ref = wh_net_reference(x, params)
    assert jnp.allclose(out, ref, rtol=1e-3, atol=1e-4), (out, ref)

    print("KERNEL_OK")
</pallas_src>

<mosaic_0001>
module attributes {stable_mosaic.version = 11 : i64} {
  func.func @_fused_stats_kernel(%arg0: i32, %arg1: i32, %arg2: memref<4xf32, #tpu.memory_space<smem>>, %arg3: memref<2x256xf32, #tpu.memory_space<vmem>>, %arg4: memref<2x256xf32, #tpu.memory_space<vmem>>, %arg5: memref<2x256xf32, #tpu.memory_space<vmem>>, %arg6: memref<1x1x2x6xf32, #tpu.memory_space<vmem>>) attributes {dimension_semantics = [#tpu.dimension_semantics<parallel>, #tpu.dimension_semantics<parallel>], iteration_bounds = array<i64: 1, 1>, scalar_prefetch = 0 : i64, scratch_operands = 0 : i64, tpu.core_type = #tpu.core_type<tc>, window_params = [{transform_indices = @transform_0, window_bounds = array<i64: 4>}, {transform_indices = @transform_1, window_bounds = array<i64: 2, 256>}, {transform_indices = @transform_2, window_bounds = array<i64: 2, 256>}, {transform_indices = @transform_3, window_bounds = array<i64: 2, 256>}, {transform_indices = @transform_4, window_bounds = array<i64: 1, 1, 2, 6>}]} {
    %c0 = arith.constant 0 : index
    %c0_0 = arith.constant 0 : index
    %0 = vector.load %arg3[%c0, %c0_0] : memref<2x256xf32, #tpu.memory_space<vmem>>, vector<2x256xf32>
    %c0_1 = arith.constant 0 : index
    %c0_2 = arith.constant 0 : index
    %1 = vector.load %arg4[%c0_1, %c0_2] : memref<2x256xf32, #tpu.memory_space<vmem>>, vector<2x256xf32>
    %c0_3 = arith.constant 0 : index
    %c0_4 = arith.constant 0 : index
    %2 = vector.load %arg5[%c0_3, %c0_4] : memref<2x256xf32, #tpu.memory_space<vmem>>, vector<2x256xf32>
    %c0_5 = arith.constant 0 : index
    %3 = memref.load %arg2[%c0_5] : memref<4xf32, #tpu.memory_space<smem>>
    %4 = vector.broadcast %3 : f32 to vector<2x256xf32>
    %5 = arith.mulf %4, %0 : vector<2x256xf32>
    %c1 = arith.constant 1 : index
    %6 = memref.load %arg2[%c1] : memref<4xf32, #tpu.memory_space<smem>>
    %7 = vector.broadcast %6 : f32 to vector<2x256xf32>
    %8 = arith.mulf %7, %1 : vector<2x256xf32>
    %9 = arith.addf %5, %8 : vector<2x256xf32>
    %c2 = arith.constant 2 : index
    %10 = memref.load %arg2[%c2] : memref<4xf32, #tpu.memory_space<smem>>
    %11 = vector.broadcast %10 : f32 to vector<2x256xf32>
    %12 = arith.mulf %11, %2 : vector<2x256xf32>
    %13 = arith.addf %9, %12 : vector<2x256xf32>
    %c3 = arith.constant 3 : index
    %14 = memref.load %arg2[%c3] : memref<4xf32, #tpu.memory_space<smem>>
    %15 = vector.broadcast %14 : f32 to vector<2x256xf32>
    %16 = arith.addf %13, %15 : vector<2x256xf32>
    %17 = math.tanh %16 : vector<2x256xf32>
    %cst = arith.constant dense<0.000000e+00> : vector<2xf32>
    %18 = vector.multi_reduction <add>, %0, %cst [1] : vector<2x256xf32> to vector<2xf32>
    %19 = vector.shape_cast %18 : vector<2xf32> to vector<2x1xf32>
    %cst_6 = arith.constant dense<0.000000e+00> : vector<2xf32>
    %20 = vector.multi_reduction <add>, %1, %cst_6 [1] : vector<2x256xf32> to vector<2xf32>
    %21 = vector.shape_cast %20 : vector<2xf32> to vector<2x1xf32>
    %cst_7 = arith.constant dense<0.000000e+00> : vector<2xf32>
    %22 = vector.multi_reduction <add>, %2, %cst_7 [1] : vector<2x256xf32> to vector<2xf32>
    %23 = vector.shape_cast %22 : vector<2xf32> to vector<2x1xf32>
    %cst_8 = arith.constant dense<0.000000e+00> : vector<2xf32>
    %24 = vector.multi_reduction <add>, %17, %cst_8 [1] : vector<2x256xf32> to vector<2xf32>
    %25 = vector.shape_cast %24 : vector<2xf32> to vector<2x1xf32>
    %cst_9 = arith.constant dense<0x7F800000> : vector<2xf32>
    %26 = vector.multi_reduction <minimumf>, %16, %cst_9 [1] : vector<2x256xf32> to vector<2xf32>
    %27 = vector.shape_cast %26 : vector<2xf32> to vector<2x1xf32>
    %cst_10 = arith.constant dense<0xFF800000> : vector<2xf32>
    %28 = vector.multi_reduction <maximumf>, %16, %cst_10 [1] : vector<2x256xf32> to vector<2xf32>
    %29 = vector.shape_cast %28 : vector<2xf32> to vector<2x1xf32>
    %30 = tpu.concatenate %19, %21, %23, %25, %27, %29 in 1 : vector<2x1xf32>, vector<2x1xf32>, vector<2x1xf32>, vector<2x1xf32>, vector<2x1xf32>, vector<2x1xf32> -> vector<2x6xf32>
    %c0_11 = arith.constant 0 : index
    %c0_12 = arith.constant 0 : index
    %c0_13 = arith.constant 0 : index
    %c0_14 = arith.constant 0 : index
    %31 = vector.load %arg6[%c0_11, %c0_12, %c0_13, %c0_14] : memref<1x1x2x6xf32, #tpu.memory_space<vmem>>, vector<1x1x2x6xf32>
    %32 = vector.shape_cast %31 : vector<1x1x2x6xf32> to vector<2x6xf32>
    %33 = vector.shape_cast %30 : vector<2x6xf32> to vector<1x1x2x6xf32>
    tpu.vector_store %arg6[%c0_11, %c0_12, %c0_13, %c0_14], %33 {strides = array<i32>} : memref<1x1x2x6xf32, #tpu.memory_space<vmem>>, vector<1x1x2x6xf32>,
    return
  }
  func.func @transform_0(%arg0: i32, %arg1: i32) -> i32 {
    %c0_i32 = arith.constant 0 : i32
    %c0_i32_0 = arith.constant 0 : i32
    return %c0_i32 : i32
  }
  func.func @transform_1(%arg0: i32, %arg1: i32) -> (i32, i32) {
    %c0_i32 = arith.constant 0 : i32
    %0 = arith.addi %c0_i32, %arg1 : i32
    %c0_i32_0 = arith.constant 0 : i32
    return %arg0, %0 : i32, i32
  }
  func.func @transform_2(%arg0: i32, %arg1: i32) -> (i32, i32) {
    %c1_i32 = arith.constant 1 : i32
    %0 = arith.addi %c1_i32, %arg1 : i32
    %c0_i32 = arith.constant 0 : i32
    return %arg0, %0 : i32, i32
  }
  func.func @transform_3(%arg0: i32, %arg1: i32) -> (i32, i32) {
    %c2_i32 = arith.constant 2 : i32
    %0 = arith.addi %c2_i32, %arg1 : i32
    %c0_i32 = arith.constant 0 : i32
    return %arg0, %0 : i32, i32
  }
  func.func @transform_4(%arg0: i32, %arg1: i32) -> (i32, i32, i32, i32) {
    %c0_i32 = arith.constant 0 : i32
    %c0_i32_0 = arith.constant 0 : i32
    %c0_i32_1 = arith.constant 0 : i32
    return %arg0, %arg1, %c0_i32, %c0_i32_0 : i32, i32, i32, i32
  }
}

</mosaic_0001>

<bundles_post_ra>
// kernel: wh_net_forward.1
= control target key start
LH: loop header
LB: loop body
LE: loop exit
PB: predicated region body
PF: predicated region fallthrough
CT: control target
= control target key end

     0   :  { %9 = vsyncpa [#allocation3], 0  ;;  %s209_s18 = smov [#allocation2]   ;;  %s262_s0 = inlined_call_operand.vmem [shape: f32[4], index: 0, kind: input, shape index: {}]   ;;  %s263_s1 = inlined_call_operand.vmem [shape: f32[2,768], index: 1, kind: input, shape index: {}, may-alias: {1,2,3}]   ;;  %s264_s2 = inlined_call_operand.vmem [shape: f32[2,768], index: 2, kind: input, shape index: {}, may-alias: {1,2,3}]   ;;  %s265_s3 = inlined_call_operand.vmem [shape: f32[2,768], index: 3, kind: input, shape index: {}, may-alias: {1,2,3}]   ;;  %s266_s4 = inlined_call_operand.vmem [shape: f32[1,1,2,6], index: 4, kind: output, shape index: {}]  }
   0x1   :  { %s15_s17 = sshll.u32 %s262_s0, 4  ;;  %s16_s17 = int_to_ptr.vmem [resolvable:$true] %s15_s17 }
   0x2   :  { %18 = dma.vmem_to_smem %s16_s17, 16, %s209_s18, [#allocation3]  }
   0x3   :  { %207 = dma.done.wait [#allocation3], 16  }
   0x4   :  { %208 = vsyncadd [#allocation3], 4294967280 }
   0x5   :  { %45 = sfence }
   0x6   :  { %v74_v0 = vld [vmem:[%s263_s1] sm:$0xf]  ;;  %s77_s21 = sld [smem:[#allocation2]]  ;;  %v187_v1 = vld [vmem:[%s264_s2 + $0x4] sm:$0xf]  ;;  %vm98_vm0 = vcmask 1041408  }
   0x7   :  { %93 = vst [vmem:[#allocation1] ss:$4 sm:$0xff] %v74_v0  ;;  %s189_s22 = sld [smem:[#allocation2 + $0x1]]  ;;  %v188_v2 = vld [vmem:[%s265_s3 + $0x8] sm:$0xf]  ;;  %vm158_vm1 = vcmask 7168  }
   0x8   :  { %s190_s23 = sld [smem:[#allocation2 + $0x2]]  ;;  %vm160_vm2 = vcmask 15360   ;;  %vm162_vm3 = vcmask 23552   ;;  %vm164_vm4 = vcmask 31744   ;;  %vm166_vm5 = vcmask 39936  }
   0x9   :  { %s191_s24 = sld [smem:[#allocation2 + $0x3]]  ;;  %vm168_vm6 = vcmask 41984  }
   0xc   :  { %v78_v3 = vstv %s77_s21 }
   0xd   :  { %v81_v4 = vstv %s189_s22  ;;  %v79_v7 = vmul.f32 %v78_v3, %v74_v0 }
   0xe   :  { %v94_v5 = vld.sshfl [vmem:[#allocation1] sm:$0xff pattern:$0x73625140]  ;;  %v95_v6 = vld.sshfl [vmem:[#allocation1 + $0x8] sm:$0xff pattern:$0x73625140]  ;;  %v82_v8 = vmul.f32 %v187_v1, %v81_v4  ;;  %v85_v9 = vstv %s190_s23 }
   0xf   :  { %v99_v10 = vsel %vm98_vm0, %v94_v5, 0.0  ;;  %v100_v11 = vsel %vm98_vm0, %v95_v6, 0.0  ;;  %105 = vst [vmem:[#allocation1] ss:$4 sm:$0xff] %v187_v1  ;;  %v86_v12 = vmul.f32 %v188_v2, %v85_v9  ;;  %v89_v15 = vstv %s191_s24 }
  0x10   :  { %v101_v13 = vadd.f32 %v100_v11, %v99_v10  ;;  %v83_v14 = vadd.f32 %v82_v8, %v79_v7 }
  0x12   :  { %102 = vadd.xlane.f32.xlu0 %v101_v13  ;;  %v87_v16 = vadd.f32 %v86_v12, %v83_v14 }
  0x14   :  { %v90_v17 = vadd.f32 %v89_v15, %v87_v16 }
  0x16   :  { %v106_v18 = vld.sshfl [vmem:[#allocation1] sm:$0xff pattern:$0x73625140]  ;;  %v107_v19 = vld.sshfl [vmem:[#allocation1 + $0x8] sm:$0xff pattern:$0x73625140]  ;;  %193 = vtanh.f32 %v90_v17 }
  0x17   :  { %116 = vst [vmem:[#allocation1] ss:$4 sm:$0xff] %v188_v2  ;;  %v110_v20 = vsel %vm98_vm0, %v106_v18, 0.0  ;;  %v111_v21 = vsel %vm98_vm0, %v107_v19, 0.0 }
  0x18   :  { %v112_v22 = vadd.f32 %v111_v21, %v110_v20 }
  0x1a   :  { %113 = vadd.xlane.f32.xlu0 %v112_v22 }
  0x1c   :  { %v194_v23 = vpop.eup %193 }
  0x1e   :  { %v117_v24 = vld.sshfl [vmem:[#allocation1] sm:$0xff pattern:$0x73625140]  ;;  %v118_v25 = vld.sshfl [vmem:[#allocation1 + $0x8] sm:$0xff pattern:$0x73625140] }
  0x1f   :  { %v121_v26 = vsel %vm98_vm0, %v117_v24, 0.0  ;;  %v122_v27 = vsel %vm98_vm0, %v118_v25, 0.0  ;;  %127 = vst [vmem:[#allocation1] ss:$4 sm:$0xff] %v194_v23 }
  0x20   :  { %v123_v28 = vadd.f32 %v122_v27, %v121_v26 }
  0x22   :  { %124 = vadd.xlane.f32.xlu1 %v123_v28 }
  0x26   :  { %v128_v29 = vld.sshfl [vmem:[#allocation1] sm:$0xff pattern:$0x73625140]  ;;  %v129_v30 = vld.sshfl [vmem:[#allocation1 + $0x8] sm:$0xff pattern:$0x73625140] }
  0x27   :  { %v132_v31 = vsel %vm98_vm0, %v128_v29, 0.0  ;;  %v133_v32 = vsel %vm98_vm0, %v129_v30, 0.0  ;;  %138 = vst [vmem:[#allocation1] ss:$4 sm:$0xff] %v90_v17 }
  0x28   :  { %v134_v33 = vadd.f32 %v133_v32, %v132_v31 }
  0x2a   :  { %135 = vadd.xlane.f32.xlu1 %v134_v33 }
  0x2e   :  { %v139_v34 = vld.sshfl [vmem:[#allocation1] sm:$0xff pattern:$0x73625140]  ;;  %v140_v35 = vld.sshfl [vmem:[#allocation1 + $0x8] sm:$0xff pattern:$0x73625140] }
  0x2f   :  { %v143_v36 = vsel %vm98_vm0, %v139_v34, inf  ;;  %v144_v37 = vsel %vm98_vm0, %v140_v35, inf  ;;  %148 = vst [vmem:[#allocation1] ss:$4 sm:$0xff] %v90_v17 }
  0x30   :  { %v145_v38 = vmin.f32 %v143_v36, %v144_v37 }
  0x32   :  { %146 = vmin.xlane.f32.xlu2 %v145_v38 }
  0x36   :  { %v149_v39 = vld.sshfl [vmem:[#allocation1] sm:$0xff pattern:$0x73625140]  ;;  %v150_v40 = vld.sshfl [vmem:[#allocation1 + $0x8] sm:$0xff pattern:$0x73625140] }
  0x37   :  { %v153_v41 = vsel %vm98_vm0, %v149_v39, -inf  ;;  %v154_v42 = vsel %vm98_vm0, %v150_v40, -inf }
  0x38   :  { %v155_v43 = vmax.f32 %v153_v41, %v154_v42 }
  0x3a   :  { %156 = vmax.xlane.f32.xlu2 %v155_v43 }
  0x85   :  { %v103_v44 = vpop.xlane.xlu0 %102 }
  0x8d   :  { %v114_v46 = vpop.xlane.xlu0 %113 }
  0x8e   :  { %v159_v47 = vsel %vm158_vm1, %v103_v44, %v114_v46 }
  0x95   :  { %v125_v45 = vpop.xlane.xlu1 %124 }
  0x96   :  { %v161_v49 = vsel %vm160_vm2, %v159_v47, %v125_v45 }
  0x9d   :  { %v136_v50 = vpop.xlane.xlu1 %135 }
  0x9e   :  { %v163_v51 = vsel %vm162_vm3, %v161_v49, %v136_v50 }
  0xa5   :  { %v147_v48 = vpop.xlane.xlu2 %146 }
  0xa6   :  { %v165_v52 = vsel %vm164_vm4, %v163_v51, %v147_v48 }
  0xad   :  { %v157_v53 = vpop.xlane.xlu2 %156 }
  0xae   :  { %v167_v54 = vsel %vm166_vm5, %v165_v52, %v157_v53 }
  0xaf   :  { %169 = vst.msk [vmem:[%s266_s4] sm:$0x3] %vm168_vm6, %v167_v54 }
  0xb0   :  { %174 = vsyncpa [#allocation3], 1 }

</bundles_post_ra>
